<compile_context>
chip_gen: v7x
topology: tpu7x:2x2x1
jax: 0.10.0
libtpu: 0.0.40
codegen_flags: <defaults>
</compile_context>

<pallas_src>
import jax
import jax.numpy as jnp
from jax.experimental import pallas as pl
from jax.experimental.pallas import tpu as pltpu


# ----------------------------------------------------------------------------
# Kernel bodies
# ----------------------------------------------------------------------------
def _attention_math(len_ref, met_ref, inp_ref, w_ref, b_ref, ml_ref):
    """Shared per-block math.  Keeps T in sublanes (keepdims form) so the score
    broadcast over H is a lane broadcast; the only relayout is the final (B,T)
    score store."""
    met = met_ref[...].astype(jnp.float32)           # (TB, T, A)
    x = inp_ref[...].astype(jnp.float32)             # (TB, T, H)
    w = w_ref[...].astype(jnp.float32)               # (1, A)
    bias = b_ref[0, 0]                               # f32 scalar (SMEM)
    max_len = ml_ref[0, 0]                           # i32 scalar (SMEM)

    # Linear(A -> 1) + tanh on the VPU; a single-column MXU matmul would waste
    # >99% of the systolic array.  keepdims keeps T in sublanes.
    logits = jnp.tanh(
        jnp.sum(met * w[None, :, :], axis=-1, keepdims=True) + bias)   # (TB, T, 1)

    # Length mask (matches get_mask: only rows with l < max_len are masked).
    lengths = len_ref[...][:, :, None]                                  # (TB, 1, 1)
    idx = jax.lax.broadcasted_iota(jnp.int32, logits.shape, 1)          # (TB, T, 1)
    keep = jnp.logical_or(lengths >= max_len, idx < lengths)            # (TB, T, 1)

    # softmax -> *mask -> /sum(masked)  ==  exp(masked) / sum(exp(masked))
    mx = jnp.max(logits, axis=1, keepdims=True)                         # (TB, 1, 1)
    e = jnp.where(keep, jnp.exp(logits - mx), 0.0)                      # (TB, T, 1)
    denom = jnp.sum(e, axis=1, keepdims=True)                           # (TB, 1, 1)
    # EUP approx reciprocal + one Newton refinement (rel err ~1e-7).
    # (length==0 rows give 0/0 -> NaN, same as the PyTorch reference.)
    r = pl.reciprocal(denom, approx=True)
    r = r * (2.0 - denom * r)
    s = e * r                                                           # (TB, T, 1)

    wt = x * s                                                          # (TB, T, H)
    rep = jnp.sum(wt, axis=1)                                           # (TB, H)
    return rep, s, wt


def _kernel_full(len_ref, met_ref, inp_ref, w_ref, b_ref, ml_ref,
                 rep_ref, sc_ref, wt_ref):
    rep, s, wt = _attention_math(len_ref, met_ref, inp_ref, w_ref, b_ref, ml_ref)
    rep_ref[...] = rep.astype(rep_ref.dtype)
    sc_ref[...] = s[:, :, 0].astype(sc_ref.dtype)   # one relayout, tiny (TB,T)
    wt_ref[...] = wt.astype(wt_ref.dtype)


def _kernel_no_weighted(len_ref, met_ref, inp_ref, w_ref, b_ref, ml_ref,
                        rep_ref, sc_ref):
    rep, s, _ = _attention_math(len_ref, met_ref, inp_ref, w_ref, b_ref, ml_ref)
    rep_ref[...] = rep.astype(rep_ref.dtype)
    sc_ref[...] = s[:, :, 0].astype(sc_ref.dtype)


# ----------------------------------------------------------------------------
# Tiling / wrapper
# ----------------------------------------------------------------------------
def _round_up(x, m):
    return ((x + m - 1) // m) * m


def _choose_tb(B, T, A, H, in_isz, out_isz, budget_bytes, with_weighted):
    """Batch-block size: as big as the VMEM budget allows (double-buffered
    in/out blocks), multiple of 8, never larger than B (so the only partial
    block is the standard ragged last one), and for big batches >= 4 (and an
    even number of) grid steps so a v7x megacore stays load-balanced."""
    per_row = 2 * (T * A * in_isz + T * H * in_isz
                   + (T * H * out_isz if with_weighted else 0)
                   + 4 * T + 4 * H + 4)
    cap = max(8, min(1024, (budget_bytes // per_row) // 8 * 8))
    if B < 8:
        return B                                  # single block == full batch dim
    cap = min(cap, (B // 8) * 8)                  # keep blocks <= array extent
    steps = -(-B // cap)
    if B // 8 >= 4 and steps < 4:                 # enough rows: feed both TCs
        steps = 4
    if steps > 1 and steps % 2:
        steps += 1                                # even step count across 2 TCs
    tb = max(8, min(cap, _round_up(-(-B // steps), 8)))
    return tb


def self_attention_metaphors(inputs, metaphor, lengths, weight, bias,
                             *, return_weighted=True, block_b=None):
    """inputs: (B, T, H); metaphor: (B, T, A); lengths: (B,) int;
    weight: (1, A) (PyTorch Linear layout); bias: (1,).

    return_weighted=False skips the (B, T, H) `weighted` HBM writeback
    (~45% of the traffic) and returns only (representations, scores)."""
    B, T, H = inputs.shape
    A = metaphor.shape[-1]

    lengths_2d = lengths.astype(jnp.int32).reshape(B, 1)
    max_len = jnp.max(lengths.astype(jnp.int32)).reshape(1, 1)   # SMEM scalar
    w_row = weight.reshape(1, A)
    b_2d = bias.reshape(1, 1).astype(jnp.float32)                # SMEM scalar

    # VMEM sizing derived from the chip: v7x has 64 MiB/TC, v5e/v6e 128 MiB.
    try:
        vmem_cap = int(pltpu.get_tpu_info().vmem_capacity_bytes)
    except Exception:
        vmem_cap = 64 << 20                        # assume smallest (v7x per-TC)
    vmem_limit = max(32 << 20, min((vmem_cap * 3) // 4, 96 << 20))

    in_isz = max(inputs.dtype.itemsize, metaphor.dtype.itemsize)
    out_isz = inputs.dtype.itemsize
    TB = block_b if block_b is not None else _choose_tb(
        B, T, A, H, in_isz, out_isz, vmem_limit // 2, return_weighted)

    grid = (pl.cdiv(B, TB),)                       # ragged last block, no padding

    smem = pl.BlockSpec(memory_space=pltpu.MemorySpace.SMEM)
    in_specs = [
        pl.BlockSpec((TB, 1), lambda b: (b, 0)),         # lengths
        pl.BlockSpec((TB, T, A), lambda b: (b, 0, 0)),   # metaphor (own dtype)
        pl.BlockSpec((TB, T, H), lambda b: (b, 0, 0)),   # inputs   (own dtype)
        pl.BlockSpec((1, A), lambda b: (0, 0)),          # weight row (VMEM)
        smem,                                            # bias scalar
        smem,                                            # max(lengths) scalar
    ]
    rep_spec = pl.BlockSpec((TB, H), lambda b: (b, 0))
    sc_spec = pl.BlockSpec((TB, T), lambda b: (b, 0))
    rep_shape = jax.ShapeDtypeStruct((B, H), inputs.dtype)
    sc_shape = jax.ShapeDtypeStruct((B, T), jnp.float32)
    cparams = pltpu.CompilerParams(
        dimension_semantics=("parallel",),
        vmem_limit_bytes=int(vmem_limit))

    args = (lengths_2d, metaphor, inputs, w_row, b_2d, max_len)

    if return_weighted:
        rep, scores, weighted = pl.pallas_call(
            _kernel_full,
            grid=grid,
            in_specs=in_specs,
            out_specs=(rep_spec, sc_spec,
                       pl.BlockSpec((TB, T, H), lambda b: (b, 0, 0))),
            out_shape=(rep_shape, sc_shape,
                       jax.ShapeDtypeStruct((B, T, H), inputs.dtype)),
            compiler_params=cparams,
        )(*args)
        # glue: matches the PyTorch .squeeze() output shapes for B > 1
        return rep, scores, weighted

    rep, scores = pl.pallas_call(
        _kernel_no_weighted,
        grid=grid,
        in_specs=in_specs,
        out_specs=(rep_spec, sc_spec),
        out_shape=(rep_shape, sc_shape),
        compiler_params=cparams,
    )(*args)
    return rep, scores


# ----------------------------------------------------------------------------
# Pure-JAX reference + self-test
# ----------------------------------------------------------------------------
def _reference(inputs, metaphor, lengths, weight, bias):
    logits = jnp.tanh(jnp.einsum("bta,oa->bto", metaphor, weight) + bias)[..., 0]
    scores = jax.nn.softmax(logits, axis=-1)
    max_len = jnp.max(lengths)
    idx = jnp.arange(inputs.shape[1])[None, :]
    mask = jnp.where(
        (lengths[:, None] >= max_len) | (idx < lengths[:, None]), 1.0, 0.0)
    masked = scores * mask
    scores = masked / jnp.sum(masked, axis=-1, keepdims=True)
    weighted = inputs * scores[..., None]
    representations = weighted.sum(axis=1)
    return representations, scores, weighted


if __name__ == "__main__":
    B, T, A, H = 2, 8, 32, 32
    key = jax.random.PRNGKey(0)
    k1, k2, k3, k4, k5, k6 = jax.random.split(key, 6)

    inputs = jax.random.normal(k1, (B, T, H), dtype=jnp.float32)
    metaphor = jax.random.normal(k2, (B, T, A), dtype=jnp.float32)
    lengths = jnp.array([8, 5], dtype=jnp.int32)

    # deterministic Linear(A, 1) parameters (synthetic, no checkpoint)
    bound = 1.0 / jnp.sqrt(A)
    weight = jax.random.uniform(k3, (1, A), jnp.float32, -bound, bound)
    bias = jax.random.uniform(k4, (1,), jnp.float32, -bound, bound)

    rep, scores, weighted = self_attention_metaphors(
        inputs, metaphor, lengths, weight, bias)
    jax.block_until_ready((rep, scores, weighted))

    rep_r, scores_r, weighted_r = _reference(inputs, metaphor, lengths, weight, bias)
    assert jnp.allclose(rep, rep_r, atol=2e-5, rtol=2e-5)
    assert jnp.allclose(scores, scores_r, atol=2e-5, rtol=2e-5)
    assert jnp.allclose(weighted, weighted_r, atol=2e-5, rtol=2e-5)

    # Second test: multi-block grid with a ragged last block (B=10, TB=8) and
    # the representations+scores-only path.
    B2 = 10
    inputs2 = jax.random.normal(k5, (B2, T, H), dtype=jnp.float32)
    metaphor2 = jax.random.normal(k6, (B2, T, A), dtype=jnp.float32)
    lengths2 = jnp.array([8, 5, 3, 8, 1, 7, 8, 2, 6, 4], dtype=jnp.int32)

    rep2, sc2, wt2 = self_attention_metaphors(
        inputs2, metaphor2, lengths2, weight, bias, block_b=8)
    rep2n, sc2n = self_attention_metaphors(
        inputs2, metaphor2, lengths2, weight, bias,
        return_weighted=False, block_b=8)
    jax.block_until_ready((rep2, sc2, wt2, rep2n, sc2n))

    rep2_r, sc2_r, wt2_r = _reference(inputs2, metaphor2, lengths2, weight, bias)
    for got, want in ((rep2, rep2_r), (sc2, sc2_r), (wt2, wt2_r),
                      (rep2n, rep2_r), (sc2n, sc2_r)):
        assert jnp.allclose(got, want, atol=2e-5, rtol=2e-5)

    print("KERNEL_OK")
</pallas_src>

<mosaic_0001>
module attributes {stable_mosaic.version = 11 : i64} {
  func.func @_kernel_full(%arg0: i32, %arg1: memref<2x1xi32, #tpu.memory_space<vmem>>, %arg2: memref<2x8x32xf32, #tpu.memory_space<vmem>>, %arg3: memref<2x8x32xf32, #tpu.memory_space<vmem>>, %arg4: memref<1x32xf32, #tpu.memory_space<vmem>>, %arg5: memref<1x1xf32, #tpu.memory_space<smem>>, %arg6: memref<1x1xi32, #tpu.memory_space<smem>>, %arg7: memref<2x32xf32, #tpu.memory_space<vmem>>, %arg8: memref<2x8xf32, #tpu.memory_space<vmem>>, %arg9: memref<2x8x32xf32, #tpu.memory_space<vmem>>) attributes {dimension_semantics = [#tpu.dimension_semantics<parallel>], iteration_bounds = array<i64: 1>, scalar_prefetch = 0 : i64, scratch_operands = 0 : i64, tpu.core_type = #tpu.core_type<tc>, window_params = [{transform_indices = @transform_0, window_bounds = array<i64: 2, 1>}, {transform_indices = @transform_1, window_bounds = array<i64: 2, 8, 32>}, {transform_indices = @transform_2, window_bounds = array<i64: 2, 8, 32>}, {pipeline_mode = #tpu.pipeline_mode<synchronous>, transform_indices = @transform_3, window_bounds = array<i64: 1, 32>}, {transform_indices = @transform_4, window_bounds = array<i64: 1, 1>}, {transform_indices = @transform_5, window_bounds = array<i64: 1, 1>}, {transform_indices = @transform_6, window_bounds = array<i64: 2, 32>}, {transform_indices = @transform_7, window_bounds = array<i64: 2, 8>}, {transform_indices = @transform_8, window_bounds = array<i64: 2, 8, 32>}]} {
    %c0 = arith.constant 0 : index
    %c0_0 = arith.constant 0 : index
    %c0_1 = arith.constant 0 : index
    %0 = vector.load %arg2[%c0, %c0_0, %c0_1] : memref<2x8x32xf32, #tpu.memory_space<vmem>>, vector<2x8x32xf32>
    %c0_2 = arith.constant 0 : index
    %c0_3 = arith.constant 0 : index
    %c0_4 = arith.constant 0 : index
    %1 = vector.load %arg3[%c0_2, %c0_3, %c0_4] : memref<2x8x32xf32, #tpu.memory_space<vmem>>, vector<2x8x32xf32>
    %c0_5 = arith.constant 0 : index
    %c0_6 = arith.constant 0 : index
    %2 = vector.load %arg4[%c0_5, %c0_6] : memref<1x32xf32, #tpu.memory_space<vmem>>, vector<1x32xf32>
    %c0_7 = arith.constant 0 : index
    %c0_8 = arith.constant 0 : index
    %3 = memref.load %arg5[%c0_7, %c0_8] : memref<1x1xf32, #tpu.memory_space<smem>>
    %c0_9 = arith.constant 0 : index
    %c0_10 = arith.constant 0 : index
    %4 = memref.load %arg6[%c0_9, %c0_10] : memref<1x1xi32, #tpu.memory_space<smem>>
    %5 = vector.shape_cast %2 : vector<1x32xf32> to vector<1x1x32xf32>
    %6 = vector.broadcast %5 : vector<1x1x32xf32> to vector<2x8x32xf32>
    %7 = arith.mulf %0, %6 : vector<2x8x32xf32>
    %cst = arith.constant dense<0.000000e+00> : vector<2x8xf32>
    %8 = vector.multi_reduction <add>, %7, %cst [2] : vector<2x8x32xf32> to vector<2x8xf32>
    %9 = vector.shape_cast %8 : vector<2x8xf32> to vector<2x8x1xf32>
    %10 = vector.broadcast %3 : f32 to vector<2x8x1xf32>
    %11 = arith.addf %9, %10 : vector<2x8x1xf32>
    %12 = math.tanh %11 : vector<2x8x1xf32>
    %c0_11 = arith.constant 0 : index
    %c0_12 = arith.constant 0 : index
    %13 = vector.load %arg1[%c0_11, %c0_12] : memref<2x1xi32, #tpu.memory_space<vmem>>, vector<2x1xi32>
    %14 = vector.shape_cast %13 : vector<2x1xi32> to vector<2x1x1xi32>
    %15 = tpu.iota {dimensions = array<i32: 1>} : vector<2x8x1xi32>
    %16 = vector.broadcast %4 : i32 to vector<2x1x1xi32>
    %17 = arith.cmpi sge, %14, %16 : vector<2x1x1xi32>
    %18 = vector.broadcast %14 : vector<2x1x1xi32> to vector<2x8x1xi32>
    %19 = arith.cmpi slt, %15, %18 : vector<2x8x1xi32>
    %20 = vector.broadcast %17 : vector<2x1x1xi1> to vector<2x8x1xi1>
    %21 = arith.ori %20, %19 : vector<2x8x1xi1>
    %cst_13 = arith.constant dense<0xFF800000> : vector<2x1xf32>
    %22 = vector.multi_reduction <maximumf>, %12, %cst_13 [1] : vector<2x8x1xf32> to vector<2x1xf32>
    %23 = vector.shape_cast %22 : vector<2x1xf32> to vector<2x1x1xf32>
    %24 = vector.broadcast %23 : vector<2x1x1xf32> to vector<2x8x1xf32>
    %25 = arith.subf %12, %24 : vector<2x8x1xf32>
    %26 = math.exp %25 : vector<2x8x1xf32>
    %cst_14 = arith.constant 0.000000e+00 : f32
    %27 = vector.broadcast %cst_14 : f32 to vector<2x8x1xf32>
    %28 = arith.select %21, %26, %27 : vector<2x8x1xi1>, vector<2x8x1xf32>
    %cst_15 = arith.constant dense<0.000000e+00> : vector<2x1xf32>
    %29 = vector.multi_reduction <add>, %28, %cst_15 [1] : vector<2x8x1xf32> to vector<2x1xf32>
    %30 = vector.shape_cast %29 : vector<2x1xf32> to vector<2x1x1xf32>
    %31 = tpu.reciprocal %30 {approx = true} : vector<2x1x1xf32> -> vector<2x1x1xf32>
    %32 = arith.mulf %30, %31 : vector<2x1x1xf32>
    %cst_16 = arith.constant 2.000000e+00 : f32
    %33 = vector.broadcast %cst_16 : f32 to vector<2x1x1xf32>
    %34 = arith.subf %33, %32 : vector<2x1x1xf32>
    %35 = arith.mulf %31, %34 : vector<2x1x1xf32>
    %36 = vector.broadcast %35 : vector<2x1x1xf32> to vector<2x8x1xf32>
    %37 = arith.mulf %28, %36 : vector<2x8x1xf32>
    %38 = vector.broadcast %37 : vector<2x8x1xf32> to vector<2x8x32xf32>
    %39 = arith.mulf %1, %38 : vector<2x8x32xf32>
    %cst_17 = arith.constant dense<0.000000e+00> : vector<2x32xf32>
    %40 = vector.multi_reduction <add>, %39, %cst_17 [1] : vector<2x8x32xf32> to vector<2x32xf32>
    %c0_18 = arith.constant 0 : index
    %c0_19 = arith.constant 0 : index
    %41 = vector.load %arg7[%c0_18, %c0_19] : memref<2x32xf32, #tpu.memory_space<vmem>>, vector<2x32xf32>
    tpu.vector_store %arg7[%c0_18, %c0_19], %40 {strides = array<i32>} : memref<2x32xf32, #tpu.memory_space<vmem>>, vector<2x32xf32>,
    %42 = vector.shape_cast %37 : vector<2x8x1xf32> to vector<2x8xf32>
    %c0_20 = arith.constant 0 : index
    %c0_21 = arith.constant 0 : index
    %43 = vector.load %arg8[%c0_20, %c0_21] : memref<2x8xf32, #tpu.memory_space<vmem>>, vector<2x8xf32>
    tpu.vector_store %arg8[%c0_20, %c0_21], %42 {strides = array<i32>} : memref<2x8xf32, #tpu.memory_space<vmem>>, vector<2x8xf32>,
    %c0_22 = arith.constant 0 : index
    %c0_23 = arith.constant 0 : index
    %c0_24 = arith.constant 0 : index
    %44 = vector.load %arg9[%c0_22, %c0_23, %c0_24] : memref<2x8x32xf32, #tpu.memory_space<vmem>>, vector<2x8x32xf32>
    tpu.vector_store %arg9[%c0_22, %c0_23, %c0_24], %39 {strides = array<i32>} : memref<2x8x32xf32, #tpu.memory_space<vmem>>, vector<2x8x32xf32>,
    return
  }
  func.func @transform_0(%arg0: i32) -> (i32, i32) {
    %c0_i32 = arith.constant 0 : i32
    %c0_i32_0 = arith.constant 0 : i32
    return %arg0, %c0_i32 : i32, i32
  }
  func.func @transform_1(%arg0: i32) -> (i32, i32, i32) {
    %c0_i32 = arith.constant 0 : i32
    %c0_i32_0 = arith.constant 0 : i32
    %c0_i32_1 = arith.constant 0 : i32
    return %arg0, %c0_i32, %c0_i32_0 : i32, i32, i32
  }
  func.func @transform_2(%arg0: i32) -> (i32, i32, i32) {
    %c0_i32 = arith.constant 0 : i32
    %c0_i32_0 = arith.constant 0 : i32
    %c0_i32_1 = arith.constant 0 : i32
    return %arg0, %c0_i32, %c0_i32_0 : i32, i32, i32
  }
  func.func @transform_3(%arg0: i32) -> (i32, i32) {
    %c0_i32 = arith.constant 0 : i32
    %c0_i32_0 = arith.constant 0 : i32
    %c0_i32_1 = arith.constant 0 : i32
    return %c0_i32, %c0_i32_0 : i32, i32
  }
  func.func @transform_4(%arg0: i32) -> (i32, i32) {
    %c0_i32 = arith.constant 0 : i32
    %c0_i32_0 = arith.constant 0 : i32
    %c0_i32_1 = arith.constant 0 : i32
    return %c0_i32, %c0_i32_0 : i32, i32
  }
  func.func @transform_5(%arg0: i32) -> (i32, i32) {
    %c0_i32 = arith.constant 0 : i32
    %c0_i32_0 = arith.constant 0 : i32
    %c0_i32_1 = arith.constant 0 : i32
    return %c0_i32, %c0_i32_0 : i32, i32
  }
  func.func @transform_6(%arg0: i32) -> (i32, i32) {
    %c0_i32 = arith.constant 0 : i32
    %c0_i32_0 = arith.constant 0 : i32
    return %arg0, %c0_i32 : i32, i32
  }
  func.func @transform_7(%arg0: i32) -> (i32, i32) {
    %c0_i32 = arith.constant 0 : i32
    %c0_i32_0 = arith.constant 0 : i32
    return %arg0, %c0_i32 : i32, i32
  }
  func.func @transform_8(%arg0: i32) -> (i32, i32, i32) {
    %c0_i32 = arith.constant 0 : i32
    %c0_i32_0 = arith.constant 0 : i32
    %c0_i32_1 = arith.constant 0 : i32
    return %arg0, %c0_i32, %c0_i32_0 : i32, i32, i32
  }
}

</mosaic_0001>

<bundles_post_ra>
// kernel: tpu_custom_call.1
= control target key start
LH: loop header
LB: loop body
LE: loop exit
PB: predicated region body
PF: predicated region fallthrough
CT: control target
= control target key end

     0   :  { %16 = vsyncpa [#allocation5], 0  ;;  %s528_s0 = inlined_call_operand.vmem [shape: s32[2,1], index: 0, kind: input, shape index: {}]   ;;  %s529_s1 = inlined_call_operand.hbm [shape: f32[2,8,32], index: 1, kind: input, shape index: {}]   ;;  %s530_s2 = inlined_call_operand.vmem [shape: f32[2,8,32], index: 2, kind: input, shape index: {}]   ;;  %s531_s3 = inlined_call_operand.vmem [shape: f32[1,32], index: 3, kind: input, shape index: {}]   ;;  %s532_s4 = inlined_call_operand.<no memory space> [shape: f32[1,1], index: 4, kind: input, shape index: {}]   ;;  %s533_s5 = inlined_call_operand.<no memory space> [shape: s32[1,1], index: 5, kind: input, shape index: {}]   ;;  %s534_s6 = inlined_call_operand.hbm [shape: f32[2,32], index: 6, kind: output, shape index: {0}]   ;;  %s535_s7 = inlined_call_operand.hbm [shape: f32[2,8], index: 7, kind: output, shape index: {1}]   ;;  %s536_s8 = inlined_call_operand.hbm [shape: f32[2,8,32], index: 8, kind: output, shape index: {2}]  }
   0x1   :  { %17 = vsyncpa [#allocation6], 0 }
   0x2   :  { %18 = vsyncpa [#allocation9], 0  ;;  %s379_s27 = smov [#allocation4]   ;;  %s285_s9 = scalar_lea.hbm %s529_s1, 256 }
   0x3   :  { %s26_s28 = sshll.u32 %s379_s27, 4  ;;  %p286_p0 = scmp.ne.s32.totalorder %s529_s1, %s285_s9  ;;  %s27_s28 = int_to_ptr.vmem [resolvable:$true] %s26_s28 }
   0x4   :  { %p289_p1 = scmp.lt.u32.totalorder %s285_s9, %s529_s1 }
   0x6   :  { %p291_p2 = pnand %p289_p1, %p286_p0 }
   0x8   :  { %294 = shalt.err (!%p291_p2)
}
   0x9   :  { %s295_s14 = scalar_lea.vmem %s27_s28, 256  ;;  %p300_p4 = scmp.lt.s32.totalorder %s27_s28, %s27_s28 }
   0xa   :  { %p296_p3 = scmp.ne.s32.totalorder %s27_s28, %s295_s14  ;;  %p301_p5 = scmp.lt.s32.totalorder %s295_s14, %s295_s14 }
   0xc   :  { %p302_p6 = por %p301_p5, %p300_p4 }
   0xe   :  { %p303_p7 = pnand %p302_p6, %p296_p3 }
  0x10   :  { %306 = shalt.err (!%p303_p7)
}
  0x11   :  { %s380_s15 = smov 128   ;;  %s381_s16 = smov 8  }
  0x12   :  { %32 = dma.hbm_to_vmem [thread:$0]  %s529_s1, 256, %s27_s28, [#allocation5], %s380_s15, %s380_s15, %s381_s16  }
  0x13   :  { %373 = dma.done.wait [#allocation5], 256  }
  0x14   :  { %374 = vsyncadd [#allocation5], 4294967040  ;;  %v44_v0 = vld [vmem:[#allocation4] sm:$0xff]  ;;  %vm59_vm0 = vcmask 261120   ;;  %v45_v2 = vld [vmem:[#allocation4 + $0x8] sm:$0xff]  ;;  %v382_v7 = vmov 0   ;;  %v66_v8 = vstv %s532_s4  ;;  %v83_v15 = vlaneseq }
  0x15   :  { %v261_v1 = vld [vmem:[%s531_s3] ss:$0 sm:$0xff]  ;;  %271 = vset.pattern.permute.xlu1 %v382_v7  ;;  %272 = vset.pattern.permute.xlu0 %v382_v7  ;;  %v383_v13 = vmov 1966171168   ;;  %v96_v30 = vstv %s533_s5  ;;  %vm143_vm6 = vcmask 7168   ;;  %s384_s26 = smov [#allocation8]  }
  0x16   :  { %v57_v3 = vmul.f32 %v261_v1, %v44_v0  ;;  %v58_v4 = vmul.f32 %v261_v1, %v45_v2  ;;  %v81_v14 = vunpack.c.l.s4 %v383_v13  ;;  %v456_v18 = vshrl.u32 %v83_v15, 7  ;;  %v262_v23 = vld.sshfl [vmem:[%s528_s0] sm:$0x11 pattern:$0x75316420]  ;;  %s233_s27 = sshll.u32 %s384_s26, 4  ;;  %s234_s27 = int_to_ptr.vmem [resolvable:$true] %s233_s27 }
  0x17   :  { %v79_v28 = vcombine.high %v262_v23, %v262_v23  ;;  %v202_v13 = vand.u32 127, %v83_v15  ;;  %vm196_vm10 = vcmask 1041409   ;;  %s385_s28 = smov [#allocation10]   ;;  %vm213_vm11 = vcmask 58368   ;;  %p312_p9 = scmp.lt.s32.totalorder %s234_s27, %s234_s27 }
  0x18   :  { %v60_v5 = vsel %vm59_vm0, %v57_v3, 0.0  ;;  %v63_v6 = vsel %vm59_vm0, %v58_v4, 0.0  ;;  %v82_v17 = vunpack.c.0.s8 %v81_v14  ;;  %v101_v38 = vsub.s32 0, %v456_v18  ;;  %v46_v14 = vld [vmem:[%s530_s2] sm:$0xff]  ;;  %s242_s29 = sshll.u32 %s385_s28, 4  ;;  %s481_s29 = int_to_ptr.vmem [resolvable:$true] %s242_s29 }
  0x19   :  { %61 = vadd.xlane.f32.xlu0 %v60_v5 }
  0x1a   :  { %v85_v22 = vsub.s32 %v82_v17, %v456_v18  ;;  %v205_v17 = vsub.s32 %v202_v13, %v456_v18 }
  0x1c   :  { %v86_v29 = vrot.slane %v262_v23, %v85_v22  ;;  %v93_v35 = vrot.slane %v79_v28, %v85_v22 }
  0x1d   :  { %64 = vadd.xlane.f32.xlu0 %v63_v6 }
  0x1e   :  { %vm97_vm1 = vcmp.ge.s32.totalorder %v86_v29, %v96_v30  ;;  %vm98_vm2 = vcmp.ge.s32.totalorder %v93_v35, %v96_v30  ;;  %v102_v43 = vrot.slane %v86_v29, %v101_v38  ;;  %v106_v47 = vrot.slane %v93_v35, %v101_v38 }
  0x1f   :  { %v109_v39 = vsel %vm97_vm1, 1, %v382_v7  ;;  %v110_v45 = vsel %vm98_vm2, 1, %v382_v7 }
  0x20   :  { %v114_v44 = vrot.slane %v109_v39, %v101_v38  ;;  %vm107_vm3 = vcmp.lt.s32.totalorder %v456_v18, %v102_v43  ;;  %v118_v48 = vrot.slane %v110_v45, %v101_v38  ;;  %vm108_vm7 = vcmp.lt.s32.totalorder %v456_v18, %v106_v47 }
  0x22   :  { %vm119_vm4 = vcmp.eq.s32.totalorder %v114_v44, 1  ;;  %vm120_vm8 = vcmp.eq.s32.totalorder %v118_v48, 1 }
  0x23   :  { %vm121_vm5 = vmor %vm119_vm4, %vm107_vm3 }
  0x24   :  { %vm122_vm9 = vmor %vm120_vm8, %vm108_vm7 }
  0xa6   :  { %v62_v9 = vpop.xlane.xlu0 %61 }
  0xa7   :  { %v67_v10 = vadd.f32 %v66_v8, %v62_v9 }
  0xa9   :  { %273 = vtanh.f32 %v67_v10 }
  0xaa   :  { %v65_v11 = vpop.xlane.xlu0 %64 }
  0xab   :  { %v68_v12 = vadd.f32 %v66_v8, %v65_v11 }
  0xad   :  { %275 = vtanh.f32 %v68_v12 }
  0xb3   :  { %v274_v16 = vpop.eup %273 }
  0xb4   :  { %v123_v19 = vrot.slane %v274_v16, 4 }
  0xb6   :  { %v124_v20 = vmax.f32 %v274_v16, %v123_v19 }
  0xb7   :  { %v276_v21 = vpop.eup %275 }
  0xb8   :  { %v125_v24 = vrot.slane %v124_v20, 2  ;;  %v129_v25 = vrot.slane %v276_v21, 4 }
  0xba   :  { %v126_v26 = vmax.f32 %v124_v20, %v125_v24  ;;  %v130_v27 = vmax.f32 %v276_v21, %v129_v25  ;;  %v47_v20 = vld [vmem:[%s530_s2 + $0x8] sm:$0xff]  ;;  %s307_s2 = scalar_lea.vmem %s234_s27, 32 }
  0xbb   :  { %p308_p8 = scmp.ne.s32.totalorder %s234_s27, %s307_s2  ;;  %p313_p10 = scmp.lt.s32.totalorder %s307_s2, %s307_s2 }
  0xbc   :  { %v127_v31 = vrot.slane %v126_v26, 1  ;;  %v131_v32 = vrot.slane %v130_v27, 2 }
  0xbd   :  { %p314_p11 = por %p313_p10, %p312_p9 }
  0xbe   :  { %v128_v33 = vmax.f32 %v126_v26, %v127_v31  ;;  %v132_v34 = vmax.f32 %v130_v27, %v131_v32 }
  0xbf   :  { %p315_p12 = pnand %p314_p11, %p308_p8 }
  0xc0   :  { %v135_v36 = vsub.f32 %v274_v16, %v128_v33  ;;  %v133_v37 = vrot.slane %v132_v34, 1 }
  0xc2   :  { %v137_v40 = vmul.f32 1.442695, %v135_v36  ;;  %v134_v41 = vmax.f32 %v132_v34, %v133_v37 }
  0xc4   :  { %277 = vpow2.f32 %v137_v40  ;;  %v136_v42 = vsub.f32 %v276_v21, %v134_v41 }
  0xc6   :  { %v139_v46 = vmul.f32 1.442695, %v136_v42 }
  0xc8   :  { %279 = vpow2.f32 %v139_v46 }
  0xce   :  { %v278_v49 = vpop.eup %277 }
  0xcf   :  { %v141_v50 = vsel %vm121_vm5, %v278_v49, 0.0 }
  0xd0   :  { %v144_v51 = vsel %vm143_vm6, %v141_v50, 0.0 }
  0xd1   :  { %v145_v52 = vrot.slane %v144_v51, 4 }
  0xd2   :  { %v280_v53 = vpop.eup %279 }
  0xd3   :  { %v146_v54 = vadd.f32 %v145_v52, %v144_v51  ;;  %v142_v55 = vsel %vm122_vm9, %v280_v53, 0.0 }
  0xd4   :  { %v151_v56 = vsel %vm143_vm6, %v142_v55, 0.0 }
  0xd5   :  { %v147_v57 = vrot.slane %v146_v54, 2  ;;  %v152_v58 = vrot.slane %v151_v56, 4 }
  0xd7   :  { %v148_v59 = vadd.f32 %v147_v57, %v146_v54  ;;  %v153_v60 = vadd.f32 %v152_v58, %v151_v56 }
  0xd9   :  { %v149_v61 = vrot.slane %v148_v59, 1  ;;  %v154_v62 = vrot.slane %v153_v60, 2 }
  0xdb   :  { %v150_v63 = vadd.f32 %v149_v61, %v148_v59  ;;  %v155_v0 = vadd.f32 %v154_v62, %v153_v60 }
  0xdd   :  { %281 = vrcp.f32 %v150_v63  ;;  %v156_v1 = vrot.slane %v155_v0, 1 }
  0xdf   :  { %v157_v2 = vadd.f32 %v156_v1, %v155_v0 }
  0xe1   :  { %283 = vrcp.f32 %v157_v2 }
  0xe7   :  { %v282_v3 = vpop.eup %281 }
  0xe8   :  { %v160_v4 = vmul.f32 %v282_v3, %v150_v63 }
  0xea   :  { %v162_v5 = vsub.f32 2.0, %v160_v4 }
  0xeb   :  { %v284_v6 = vpop.eup %283 }
  0xec   :  { %v164_v7 = vmul.f32 %v282_v3, %v162_v5  ;;  %v161_v8 = vmul.f32 %v284_v6, %v157_v2 }
  0xee   :  { %v166_v9 = vmul.f32 %v164_v7, %v141_v50  ;;  %v163_v10 = vsub.f32 2.0, %v161_v8 }
  0xf0   :  { %170 = vperm.xlu1 %271, %v166_v9   ;;  %v165_v11 = vmul.f32 %v284_v6, %v163_v10 }
  0xf2   :  { %v167_v12 = vmul.f32 %v165_v11, %v142_v55 }
  0xf4   :  { %175 = vperm.xlu1 %271, %v167_v12  }
 0x16f   :  { %v171_v16 = vpop.permute.xlu1 %170 }
 0x170   :  { %v178_v19 = vmul.f32 %v171_v16, %v46_v14  ;;  %v206_v23 = vrot.slane %v171_v16, %v205_v17 }
 0x172   :  { %v180_v21 = vsel %vm59_vm0, %v178_v19, 0.0  ;;  %215 = vst.msk [vmem:[#allocation10] sm:$0xff] %vm59_vm0, %v178_v19 }
 0x173   :  { %v181_v22 = vrot.slane %v180_v21, 4  ;;  %v176_v15 = vpop.permute.xlu1 %175 }
 0x174   :  { %v179_v24 = vmul.f32 %v176_v15, %v47_v20  ;;  %v210_v25 = vrot.slane %v176_v15, %v205_v17 }
 0x175   :  { %v182_v18 = vadd.f32 %v181_v22, %v180_v21 }
 0x176   :  { %v187_v26 = vsel %vm59_vm0, %v179_v24, 0.0  ;;  %216 = vst.msk [vmem:[#allocation10 + $0x8] sm:$0xff] %vm59_vm0, %v179_v24  ;;  %v211_v27 = vsel %vm196_vm10, %v210_v25, %v206_v23 }
 0x177   :  { %v183_v28 = vrot.slane %v182_v18, 2  ;;  %v188_v29 = vrot.slane %v187_v26, 4  ;;  %214 = vst.msk [vmem:[#allocation8] sm:$0x3] %vm213_vm11, %v211_v27 }
 0x178   :  { %318 = shalt.err (!%p315_p12)
}
 0x179   :  { %s319_s10 = scalar_lea.hbm %s535_s7, 32 }
 0x17a   :  { %p320_p13 = scmp.ne.s32.totalorder %s535_s7, %s319_s10  ;;  %p323_p0 = scmp.lt.u32.totalorder %s319_s10, %s535_s7 }
 0x17c   :  { %p325_p1 = pnand %p323_p0, %p320_p13 }
 0x17e   :  { %328 = shalt.err (!%p325_p1)
}
 0x17f   :  { %236 = dma.vmem_to_hbm [thread:$0]  %s234_s27, 32, %s535_s7, [#allocation9]   ;;  %v184_v30 = vadd.f32 %v183_v28, %v182_v18  ;;  %v189_v31 = vadd.f32 %v188_v29, %v187_v26 }
 0x180   :  { %s329_s19 = scalar_lea.vmem %s481_s29, 256  ;;  %p334_p3 = scmp.lt.s32.totalorder %s481_s29, %s481_s29 }
 0x181   :  { %p330_p2 = scmp.ne.s32.totalorder %s481_s29, %s329_s19  ;;  %p335_p4 = scmp.lt.s32.totalorder %s329_s19, %s329_s19 }
 0x183   :  { %p336_p5 = por %p335_p4, %p334_p3 }
 0x185   :  { %p337_p6 = pnand %p336_p5, %p330_p2 }
 0x187   :  { %340 = shalt.err (!%p337_p6)
}
 0x188   :  { %s341_s21 = scalar_lea.hbm %s536_s8, 256 }
 0x189   :  { %p342_p7 = scmp.ne.s32.totalorder %s536_s8, %s341_s21  ;;  %p345_p8 = scmp.lt.u32.totalorder %s341_s21, %s536_s8 }
 0x18b   :  { %p347_p9 = pnand %p345_p8, %p342_p7 }
 0x18d   :  { %350 = shalt.err (!%p347_p9)
}
 0x18e   :  { %248 = dma.vmem_to_hbm [thread:$0]  %s481_s29, 256, %s536_s8, [#allocation9], %s380_s15, %s380_s15, %s381_s16   ;;  %v190_v32 = vrot.slane %v189_v31, 2  ;;  %v185_v33 = vrot.slane %v184_v30, 1  ;;  %vm199_vm12 = vcmask 254976  }
 0x18f   :  { %s386_s5 = smov [#allocation7]  }
 0x190   :  { %v191_v34 = vadd.f32 %v190_v32, %v189_v31  ;;  %s223_s24 = sshll.u32 %s386_s5, 4  ;;  %v186_v37 = vadd.f32 %v185_v33, %v184_v30  ;;  %s224_s24 = int_to_ptr.vmem [resolvable:$true] %s223_s24 }
 0x191   :  { %s351_s25 = scalar_lea.vmem %s224_s24, 32  ;;  %p356_p11 = scmp.lt.s32.totalorder %s224_s24, %s224_s24 }
 0x192   :  { %v192_v35 = vrot.slane %v191_v34, 1  ;;  %p352_p10 = scmp.ne.s32.totalorder %s224_s24, %s351_s25  ;;  %p357_p12 = scmp.lt.s32.totalorder %s351_s25, %s351_s25 }
 0x194   :  { %v193_v36 = vadd.f32 %v192_v35, %v191_v34  ;;  %p358_p13 = por %p357_p12, %p356_p11 }
 0x196   :  { %v197_v38 = vsel %vm196_vm10, %v193_v36, %v186_v37  ;;  %p359_p0 = pnand %p358_p13, %p352_p10 }
 0x197   :  { %200 = vst.msk [vmem:[#allocation7] sm:$0x3] %vm199_vm12, %v197_v38 }
 0x198   :  { %362 = shalt.err (!%p359_p0)
}
 0x199   :  { %s363_s16 = scalar_lea.hbm %s534_s6, 32 }
 0x19a   :  { %p364_p1 = scmp.ne.s32.totalorder %s534_s6, %s363_s16  ;;  %p367_p2 = scmp.lt.u32.totalorder %s363_s16, %s534_s6 }
 0x19c   :  { %p369_p3 = pnand %p367_p2, %p364_p1 }
 0x19e   :  { %372 = shalt.err (!%p369_p3)
}
 0x19f   :  { %226 = dma.vmem_to_hbm [thread:$0]  %s224_s24, 32, %s534_s6, [#allocation6]  }
 0x1a0   :  { %375 = dma.done.wait [#allocation6], 32  }
 0x1a1   :  { %376 = vsyncadd [#allocation6], 4294967264 }
 0x1a2   :  { %377 = dma.done.wait [#allocation9], 288  }
 0x1a3   :  { %378 = vsyncadd [#allocation9], 4294967008 }
 0x1a4   :  { %258 = vsyncpa [#allocation5], 1 }
 0x1a5   :  { %259 = vsyncpa [#allocation6], 1 }
 0x1a6   :  { %260 = vsyncpa [#allocation9], 1 }

</bundles_post_ra>
